<compile_context>
chip_gen: v5e
topology: v5e:2x2
jax: 0.10.0
libtpu: 0.0.40
codegen_flags: <defaults>
</compile_context>

<pallas_src>
import math
import functools

import jax
import jax.numpy as jnp
from jax import lax
from jax.experimental import pallas as pl
from jax.experimental.pallas import tpu as pltpu


def _round_up(n, m):
    return ((n + m - 1) // m) * m


def _largest_divisor_le(n, cap):
    cap = max(1, min(n, cap))
    for d in range(cap, 0, -1):
        if n % d == 0:
            return d
    return 1


def lstm_kernel(xw_ref, u_ref, dw_ref, db_ref, out_ref, h_ref, c_ref):
    """One (batch-tile, time-chunk) step of the LSTM recurrence + dense head.

    xw_ref : (Sc, Bt, 4H) f32   precomputed x@W + bias, time-leading chunk
    u_ref  : (H, 4H)      mm    recurrent weights (original PyTorch layout)
    dw_ref : (H, O)       mm    dense head weights
    db_ref : (1, O)       f32   dense head bias
    out_ref: (Bt, O)      f32   output (written on the last time chunk only)
    h_ref  : (Bt, H)      f32   hidden state carried across time chunks
    c_ref  : (Bt, H)      f32   cell state carried across time chunks
    """
    s = pl.program_id(1)
    n_chunks = pl.num_programs(1)
    Sc = xw_ref.shape[0]
    H = u_ref.shape[0]
    mm_dtype = u_ref.dtype

    @pl.when(s == 0)
    def _():
        h_ref[...] = jnp.zeros_like(h_ref)
        c_ref[...] = jnp.zeros_like(c_ref)

    def step(t, carry):
        h, c = carry                                   # f32 (Bt, H)
        # ONE fused gate matmul per step: (Bt,H) @ (H,4H); U streamed from VMEM.
        gates = xw_ref[t] + jnp.dot(h.astype(mm_dtype), u_ref[...],
                                    preferred_element_type=jnp.float32)
        sg = jax.nn.sigmoid(gates)                     # full-4H EUP pass
        tg = jnp.tanh(gates)                           # full-4H EUP pass
        i_t = sg[:, 0 * H:1 * H]
        f_t = sg[:, 1 * H:2 * H]
        g_t = tg[:, 2 * H:3 * H]
        o_t = sg[:, 3 * H:4 * H]
        c = f_t * c + i_t * g_t
        h = o_t * jnp.tanh(c)
        return h, c

    # Capped unroll: enough LLO visibility, bounded vreg pressure for large H.
    h, c = lax.fori_loop(0, Sc, step, (h_ref[...], c_ref[...]),
                         unroll=max(1, min(8, Sc)))
    h_ref[...] = h
    c_ref[...] = c

    @pl.when(s == n_chunks - 1)
    def _():
        out_ref[...] = (jnp.dot(h.astype(mm_dtype), dw_ref[...],
                                preferred_element_type=jnp.float32) + db_ref[...])


@functools.partial(jax.jit, static_argnames=("matmul_dtype", "batch_tile"))
def custom_lstm_forward(x, W, U, bias, dense_w, dense_b,
                        matmul_dtype=jnp.float32, batch_tile=128):
    """x: (B, S, I) float32. Returns (B, O, 1) float32 (matches CustomLSTM.forward)."""
    B, S, I = x.shape
    H = U.shape[0]
    O = dense_w.shape[1]
    H4 = 4 * H

    # ---- batch padding / tiling ----------------------------------------------
    B8 = _round_up(B, 8)
    Bt = min(batch_tile, B8)
    # v7x has 2 TensorCores: make sure the parallel batch axis has >= 2 steps
    # whenever the (padded) batch can be split.
    if B8 // Bt < 2 and B8 > 8:
        Bt = max(8, _round_up(B8 // 2, 8))
    B_pad = _round_up(B8, Bt)
    x_p = jnp.pad(x, ((0, B_pad - B), (0, 0), (0, 0)))

    # ---- hoisted input projection + bias (plain XLA, off the serial path) ----
    # Lane-dense (4H) kernel input; removes the lane-padded (.., I) x tile and W
    # from the kernel entirely.
    xw = (jnp.dot(x_p.reshape(B_pad * S, I).astype(matmul_dtype),
                  W.astype(matmul_dtype),
                  preferred_element_type=jnp.float32)
          .reshape(B_pad, S, H4) + bias.astype(jnp.float32))
    xw = jnp.transpose(xw, (1, 0, 2))                  # (S, B_pad, 4H), time-leading

    # ---- time chunking sized for v7x's 64 MiB VMEM ----------------------------
    XW_VMEM_BUDGET = 32 << 20                          # double-buffered xw stream budget
    max_chunk = max(1, XW_VMEM_BUDGET // (2 * Bt * H4 * 4))
    Sc = S if S <= max_chunk else _largest_divisor_le(S, max_chunk)
    n_chunks = S // Sc
    # TODO(synk): if S has no convenient divisor <= max_chunk, Sc degrades toward 1;
    # a BoundedSlice tail chunk would avoid that without padding the time axis.

    # ---- weight prep -----------------------------------------------------------
    U_p = U.astype(matmul_dtype)                       # (H, 4H), original layout
    dw_p = dense_w.astype(matmul_dtype)                # (H, O)
    db_p = dense_b.reshape(1, O).astype(jnp.float32)   # (1, O)

    # ---- VMEM budget -----------------------------------------------------------
    mm_bytes = jnp.dtype(matmul_dtype).itemsize
    vmem_est = (2 * Sc * Bt * H4 * 4                   # xw chunk, double-buffered
                + 2 * H * H4 * mm_bytes                # U
                + 2 * H * O * mm_bytes                 # dense_w
                + 2 * O * 4                            # dense_b
                + 2 * Bt * O * 4                       # output block
                + 2 * Bt * H * 4)                      # h/c scratch
    vmem_limit = int(min(max(2 * vmem_est, 16 << 20), 48 << 20))

    grid = (B_pad // Bt, n_chunks)
    out = pl.pallas_call(
        lstm_kernel,
        out_shape=jax.ShapeDtypeStruct((B_pad, O), jnp.float32),
        grid=grid,
        in_specs=[
            pl.BlockSpec((Sc, Bt, H4), lambda b, s: (s, b, 0)),   # xw (streamed chunks)
            pl.BlockSpec((H, H4), lambda b, s: (0, 0)),           # U
            pl.BlockSpec((H, O), lambda b, s: (0, 0)),            # dense_w
            pl.BlockSpec((1, O), lambda b, s: (0, 0)),            # dense_b
        ],
        out_specs=pl.BlockSpec((Bt, O), lambda b, s: (b, 0)),
        scratch_shapes=[pltpu.VMEM((Bt, H), jnp.float32),         # h carry
                        pltpu.VMEM((Bt, H), jnp.float32)],        # c carry
        compiler_params=pltpu.CompilerParams(
            dimension_semantics=("parallel", "arbitrary"),
            vmem_limit_bytes=vmem_limit),
    )(xw, U_p, dw_p, db_p)

    return out[:B, :, None]                            # (B, O, 1) — mirrors unsqueeze(2)


def default_matmul_dtype():
    """bf16 matmul operands on v6e/v7x-class chips, f32 elsewhere (e.g. v5e VPU has no bf16)."""
    try:
        kind = jax.devices()[0].device_kind.lower()
    except Exception:
        return jnp.float32
    return jnp.bfloat16 if any(t in kind for t in ("v6", "v7", "trillium")) else jnp.float32


def init_params(key, input_size, hidden_size, out_size):
    """Deterministic init mirroring CustomLSTM.init_weights (uniform(-stdv, stdv))."""
    stdv = 1.0 / math.sqrt(hidden_size)
    k1, k2, k3, k4 = jax.random.split(key, 4)
    W = jax.random.uniform(k1, (input_size, 4 * hidden_size), jnp.float32, -stdv, stdv)
    U = jax.random.uniform(k2, (hidden_size, 4 * hidden_size), jnp.float32, -stdv, stdv)
    bias = jax.random.uniform(k3, (4 * hidden_size,), jnp.float32, -stdv, stdv)
    dense_w = jax.random.uniform(k4, (hidden_size, out_size), jnp.float32, -stdv, stdv)
    dense_b = jnp.zeros((out_size,), jnp.float32)   # dense.bias.data.zero_()
    return W, U, bias, dense_w, dense_b


def _reference_forward(x, W, U, bias, dense_w, dense_b):
    """Pure-JAX reference of the PyTorch forward for a sanity check."""
    B, S, _ = x.shape
    H = U.shape[0]
    h = jnp.zeros((B, H), jnp.float32)
    c = jnp.zeros((B, H), jnp.float32)
    for t in range(S):
        gates = x[:, t, :] @ W + h @ U + bias
        i_t = jax.nn.sigmoid(gates[:, :H])
        f_t = jax.nn.sigmoid(gates[:, H:2 * H])
        g_t = jnp.tanh(gates[:, 2 * H:3 * H])
        o_t = jax.nn.sigmoid(gates[:, 3 * H:])
        c = f_t * c + i_t * g_t
        h = o_t * jnp.tanh(c)
    out = h @ dense_w + dense_b
    return out[:, :, None]


if __name__ == "__main__":
    # Small shapes consistent with the module's forward: x is (batch, seq_len, input_size).
    batch, seq_len, input_size, hidden_size, out_size = 2, 8, 4, 32, 16

    key = jax.random.PRNGKey(0)
    kx, kp = jax.random.split(key)
    x = jax.random.normal(kx, (batch, seq_len, input_size), jnp.float32)
    W, U, bias, dense_w, dense_b = init_params(kp, input_size, hidden_size, out_size)

    ref = _reference_forward(x, W, U, bias, dense_w, dense_b)

    # f32 matmul operands: must match the reference tightly.
    out = custom_lstm_forward(x, W, U, bias, dense_w, dense_b)
    out = jax.block_until_ready(out)
    assert out.shape == (batch, out_size, 1), out.shape
    assert jnp.allclose(out, ref, atol=1e-5, rtol=1e-5), "f32 kernel mismatch vs reference"

    # Default-on-this-chip matmul dtype (bf16 on v6e/v7x MXU path; f32 on v5e).
    # Note: in the bf16 path h is re-cast to bf16 each step; rounding compounds
    # over very long sequences (fine for inference at this tolerance).
    mm_dt = default_matmul_dtype()
    out2 = custom_lstm_forward(x, W, U, bias, dense_w, dense_b, matmul_dtype=mm_dt)
    out2 = jax.block_until_ready(out2)
    assert out2.shape == (batch, out_size, 1), out2.shape
    tol = 1e-5 if mm_dt == jnp.float32 else 5e-2
    assert jnp.allclose(out2, ref, atol=tol, rtol=tol), "kernel mismatch vs reference"

    print("KERNEL_OK")
</pallas_src>

<mosaic_0001>
module attributes {stable_mosaic.version = 11 : i64} {
  func.func @lstm_kernel(%arg0: i32, %arg1: i32, %arg2: memref<8x8x128xf32, #tpu.memory_space<vmem>>, %arg3: memref<32x128xf32, #tpu.memory_space<vmem>>, %arg4: memref<32x16xf32, #tpu.memory_space<vmem>>, %arg5: memref<1x16xf32, #tpu.memory_space<vmem>>, %arg6: memref<8x16xf32, #tpu.memory_space<vmem>>, %arg7: memref<8x32xf32, #tpu.memory_space<vmem>>, %arg8: memref<8x32xf32, #tpu.memory_space<vmem>>) attributes {dimension_semantics = [#tpu.dimension_semantics<parallel>, #tpu.dimension_semantics<arbitrary>], iteration_bounds = array<i64: 1, 1>, scalar_prefetch = 0 : i64, scratch_operands = 2 : i64, tpu.core_type = #tpu.core_type<tc>, window_params = [{transform_indices = @transform_0, window_bounds = array<i64: 8, 8, 128>}, {pipeline_mode = #tpu.pipeline_mode<synchronous>, transform_indices = @transform_1, window_bounds = array<i64: 32, 128>}, {pipeline_mode = #tpu.pipeline_mode<synchronous>, transform_indices = @transform_2, window_bounds = array<i64: 32, 16>}, {pipeline_mode = #tpu.pipeline_mode<synchronous>, transform_indices = @transform_3, window_bounds = array<i64: 1, 16>}, {transform_indices = @transform_4, window_bounds = array<i64: 8, 16>}]} {
    %c0_i32 = arith.constant 0 : i32
    %0 = arith.cmpi eq, %arg1, %c0_i32 : i32
    %1 = arith.extui %0 : i1 to i32
    %c0_i32_0 = arith.constant 0 : i32
    %2 = arith.cmpi ne, %1, %c0_i32_0 : i32
    scf.if %2 {
      %cst_58 = arith.constant 0.000000e+00 : f32
      %178 = vector.broadcast %cst_58 : f32 to vector<8x32xf32>
      %c0_59 = arith.constant 0 : index
      %c0_60 = arith.constant 0 : index
      %179 = vector.load %arg7[%c0_59, %c0_60] : memref<8x32xf32, #tpu.memory_space<vmem>>, vector<8x32xf32>
      tpu.vector_store %arg7[%c0_59, %c0_60], %178 {strides = array<i32>} : memref<8x32xf32, #tpu.memory_space<vmem>>, vector<8x32xf32>,
      %cst_61 = arith.constant 0.000000e+00 : f32
      %180 = vector.broadcast %cst_61 : f32 to vector<8x32xf32>
      %c0_62 = arith.constant 0 : index
      %c0_63 = arith.constant 0 : index
      %181 = vector.load %arg8[%c0_62, %c0_63] : memref<8x32xf32, #tpu.memory_space<vmem>>, vector<8x32xf32>
      tpu.vector_store %arg8[%c0_62, %c0_63], %180 {strides = array<i32>} : memref<8x32xf32, #tpu.memory_space<vmem>>, vector<8x32xf32>,
    } else {
    }
    %c0 = arith.constant 0 : index
    %c0_1 = arith.constant 0 : index
    %3 = vector.load %arg7[%c0, %c0_1] : memref<8x32xf32, #tpu.memory_space<vmem>>, vector<8x32xf32>
    %c0_2 = arith.constant 0 : index
    %c0_3 = arith.constant 0 : index
    %4 = vector.load %arg8[%c0_2, %c0_3] : memref<8x32xf32, #tpu.memory_space<vmem>>, vector<8x32xf32>
    %c0_i32_4 = arith.constant 0 : i32
    %5 = arith.index_cast %c0_i32_4 : i32 to index
    %c0_5 = arith.constant 0 : index
    %c0_6 = arith.constant 0 : index
    %6 = vector.load %arg2[%5, %c0_5, %c0_6] : memref<8x8x128xf32, #tpu.memory_space<vmem>>, vector<1x8x128xf32>
    %7 = vector.shape_cast %6 : vector<1x8x128xf32> to vector<8x128xf32>
    %c0_7 = arith.constant 0 : index
    %c0_8 = arith.constant 0 : index
    %8 = vector.load %arg3[%c0_7, %c0_8] : memref<32x128xf32, #tpu.memory_space<vmem>>, vector<32x128xf32>
    %cst = arith.constant dense<0.000000e+00> : vector<8x128xf32>
    %9 = tpu.matmul %3, %8, %cst {dimension_numbers = #tpu.dot_dimension_numbers<[1], [0], [0], [1], [0, 0, 1, 1], [], []>} : vector<8x32xf32>, vector<32x128xf32>, vector<8x128xf32> -> vector<8x128xf32>
    %10 = arith.addf %7, %9 : vector<8x128xf32>
    %11 = arith.negf %10 : vector<8x128xf32>
    %12 = math.exp %11 : vector<8x128xf32>
    %cst_9 = arith.constant 1.000000e+00 : f32
    %13 = vector.broadcast %cst_9 : f32 to vector<8x128xf32>
    %14 = arith.addf %13, %12 : vector<8x128xf32>
    %15 = arith.divf %13, %14 : vector<8x128xf32>
    %16 = math.tanh %10 : vector<8x128xf32>
    %17 = vector.extract_strided_slice %15 {offsets = [0, 0], sizes = [8, 32], strides = [1, 1]} : vector<8x128xf32> to vector<8x32xf32>
    %18 = vector.extract_strided_slice %15 {offsets = [0, 32], sizes = [8, 32], strides = [1, 1]} : vector<8x128xf32> to vector<8x32xf32>
    %19 = vector.extract_strided_slice %16 {offsets = [0, 64], sizes = [8, 32], strides = [1, 1]} : vector<8x128xf32> to vector<8x32xf32>
    %20 = vector.extract_strided_slice %15 {offsets = [0, 96], sizes = [8, 32], strides = [1, 1]} : vector<8x128xf32> to vector<8x32xf32>
    %21 = arith.mulf %18, %4 : vector<8x32xf32>
    %22 = arith.mulf %17, %19 : vector<8x32xf32>
    %23 = arith.addf %21, %22 : vector<8x32xf32>
    %24 = math.tanh %23 : vector<8x32xf32>
    %25 = arith.mulf %20, %24 : vector<8x32xf32>
    %c1_i32 = arith.constant 1 : i32
    %26 = arith.index_cast %c1_i32 : i32 to index
    %c0_10 = arith.constant 0 : index
    %c0_11 = arith.constant 0 : index
    %27 = vector.load %arg2[%26, %c0_10, %c0_11] : memref<8x8x128xf32, #tpu.memory_space<vmem>>, vector<1x8x128xf32>
    %28 = vector.shape_cast %27 : vector<1x8x128xf32> to vector<8x128xf32>
    %c0_12 = arith.constant 0 : index
    %c0_13 = arith.constant 0 : index
    %29 = vector.load %arg3[%c0_12, %c0_13] : memref<32x128xf32, #tpu.memory_space<vmem>>, vector<32x128xf32>
    %cst_14 = arith.constant dense<0.000000e+00> : vector<8x128xf32>
    %30 = tpu.matmul %25, %29, %cst_14 {dimension_numbers = #tpu.dot_dimension_numbers<[1], [0], [0], [1], [0, 0, 1, 1], [], []>} : vector<8x32xf32>, vector<32x128xf32>, vector<8x128xf32> -> vector<8x128xf32>
    %31 = arith.addf %28, %30 : vector<8x128xf32>
    %32 = arith.negf %31 : vector<8x128xf32>
    %33 = math.exp %32 : vector<8x128xf32>
    %cst_15 = arith.constant 1.000000e+00 : f32
    %34 = vector.broadcast %cst_15 : f32 to vector<8x128xf32>
    %35 = arith.addf %34, %33 : vector<8x128xf32>
    %36 = arith.divf %34, %35 : vector<8x128xf32>
    %37 = math.tanh %31 : vector<8x128xf32>
    %38 = vector.extract_strided_slice %36 {offsets = [0, 0], sizes = [8, 32], strides = [1, 1]} : vector<8x128xf32> to vector<8x32xf32>
    %39 = vector.extract_strided_slice %36 {offsets = [0, 32], sizes = [8, 32], strides = [1, 1]} : vector<8x128xf32> to vector<8x32xf32>
    %40 = vector.extract_strided_slice %37 {offsets = [0, 64], sizes = [8, 32], strides = [1, 1]} : vector<8x128xf32> to vector<8x32xf32>
    %41 = vector.extract_strided_slice %36 {offsets = [0, 96], sizes = [8, 32], strides = [1, 1]} : vector<8x128xf32> to vector<8x32xf32>
    %42 = arith.mulf %39, %23 : vector<8x32xf32>
    %43 = arith.mulf %38, %40 : vector<8x32xf32>
    %44 = arith.addf %42, %43 : vector<8x32xf32>
    %45 = math.tanh %44 : vector<8x32xf32>
    %46 = arith.mulf %41, %45 : vector<8x32xf32>
    %c2_i32 = arith.constant 2 : i32
    %47 = arith.index_cast %c2_i32 : i32 to index
    %c0_16 = arith.constant 0 : index
    %c0_17 = arith.constant 0 : index
    %48 = vector.load %arg2[%47, %c0_16, %c0_17] : memref<8x8x128xf32, #tpu.memory_space<vmem>>, vector<1x8x128xf32>
    %49 = vector.shape_cast %48 : vector<1x8x128xf32> to vector<8x128xf32>
    %c0_18 = arith.constant 0 : index
    %c0_19 = arith.constant 0 : index
    %50 = vector.load %arg3[%c0_18, %c0_19] : memref<32x128xf32, #tpu.memory_space<vmem>>, vector<32x128xf32>
    %cst_20 = arith.constant dense<0.000000e+00> : vector<8x128xf32>
    %51 = tpu.matmul %46, %50, %cst_20 {dimension_numbers = #tpu.dot_dimension_numbers<[1], [0], [0], [1], [0, 0, 1, 1], [], []>} : vector<8x32xf32>, vector<32x128xf32>, vector<8x128xf32> -> vector<8x128xf32>
    %52 = arith.addf %49, %51 : vector<8x128xf32>
    %53 = arith.negf %52 : vector<8x128xf32>
    %54 = math.exp %53 : vector<8x128xf32>
    %cst_21 = arith.constant 1.000000e+00 : f32
    %55 = vector.broadcast %cst_21 : f32 to vector<8x128xf32>
    %56 = arith.addf %55, %54 : vector<8x128xf32>
    %57 = arith.divf %55, %56 : vector<8x128xf32>
    %58 = math.tanh %52 : vector<8x128xf32>
    %59 = vector.extract_strided_slice %57 {offsets = [0, 0], sizes = [8, 32], strides = [1, 1]} : vector<8x128xf32> to vector<8x32xf32>
    %60 = vector.extract_strided_slice %57 {offsets = [0, 32], sizes = [8, 32], strides = [1, 1]} : vector<8x128xf32> to vector<8x32xf32>
    %61 = vector.extract_strided_slice %58 {offsets = [0, 64], sizes = [8, 32], strides = [1, 1]} : vector<8x128xf32> to vector<8x32xf32>
    %62 = vector.extract_strided_slice %57 {offsets = [0, 96], sizes = [8, 32], strides = [1, 1]} : vector<8x128xf32> to vector<8x32xf32>
    %63 = arith.mulf %60, %44 : vector<8x32xf32>
    %64 = arith.mulf %59, %61 : vector<8x32xf32>
    %65 = arith.addf %63, %64 : vector<8x32xf32>
    %66 = math.tanh %65 : vector<8x32xf32>
    %67 = arith.mulf %62, %66 : vector<8x32xf32>
    %c3_i32 = arith.constant 3 : i32
    %68 = arith.index_cast %c3_i32 : i32 to index
    %c0_22 = arith.constant 0 : index
    %c0_23 = arith.constant 0 : index
    %69 = vector.load %arg2[%68, %c0_22, %c0_23] : memref<8x8x128xf32, #tpu.memory_space<vmem>>, vector<1x8x128xf32>
    %70 = vector.shape_cast %69 : vector<1x8x128xf32> to vector<8x128xf32>
    %c0_24 = arith.constant 0 : index
    %c0_25 = arith.constant 0 : index
    %71 = vector.load %arg3[%c0_24, %c0_25] : memref<32x128xf32, #tpu.memory_space<vmem>>, vector<32x128xf32>
    %cst_26 = arith.constant dense<0.000000e+00> : vector<8x128xf32>
    %72 = tpu.matmul %67, %71, %cst_26 {dimension_numbers = #tpu.dot_dimension_numbers<[1], [0], [0], [1], [0, 0, 1, 1], [], []>} : vector<8x32xf32>, vector<32x128xf32>, vector<8x128xf32> -> vector<8x128xf32>
    %73 = arith.addf %70, %72 : vector<8x128xf32>
    %74 = arith.negf %73 : vector<8x128xf32>
    %75 = math.exp %74 : vector<8x128xf32>
    %cst_27 = arith.constant 1.000000e+00 : f32
    %76 = vector.broadcast %cst_27 : f32 to vector<8x128xf32>
    %77 = arith.addf %76, %75 : vector<8x128xf32>
    %78 = arith.divf %76, %77 : vector<8x128xf32>
    %79 = math.tanh %73 : vector<8x128xf32>
    %80 = vector.extract_strided_slice %78 {offsets = [0, 0], sizes = [8, 32], strides = [1, 1]} : vector<8x128xf32> to vector<8x32xf32>
    %81 = vector.extract_strided_slice %78 {offsets = [0, 32], sizes = [8, 32], strides = [1, 1]} : vector<8x128xf32> to vector<8x32xf32>
    %82 = vector.extract_strided_slice %79 {offsets = [0, 64], sizes = [8, 32], strides = [1, 1]} : vector<8x128xf32> to vector<8x32xf32>
    %83 = vector.extract_strided_slice %78 {offsets = [0, 96], sizes = [8, 32], strides = [1, 1]} : vector<8x128xf32> to vector<8x32xf32>
    %84 = arith.mulf %81, %65 : vector<8x32xf32>
    %85 = arith.mulf %80, %82 : vector<8x32xf32>
    %86 = arith.addf %84, %85 : vector<8x32xf32>
    %87 = math.tanh %86 : vector<8x32xf32>
    %88 = arith.mulf %83, %87 : vector<8x32xf32>
    %c4_i32 = arith.constant 4 : i32
    %89 = arith.index_cast %c4_i32 : i32 to index
    %c0_28 = arith.constant 0 : index
    %c0_29 = arith.constant 0 : index
    %90 = vector.load %arg2[%89, %c0_28, %c0_29] : memref<8x8x128xf32, #tpu.memory_space<vmem>>, vector<1x8x128xf32>
    %91 = vector.shape_cast %90 : vector<1x8x128xf32> to vector<8x128xf32>
    %c0_30 = arith.constant 0 : index
    %c0_31 = arith.constant 0 : index
    %92 = vector.load %arg3[%c0_30, %c0_31] : memref<32x128xf32, #tpu.memory_space<vmem>>, vector<32x128xf32>
    %cst_32 = arith.constant dense<0.000000e+00> : vector<8x128xf32>
    %93 = tpu.matmul %88, %92, %cst_32 {dimension_numbers = #tpu.dot_dimension_numbers<[1], [0], [0], [1], [0, 0, 1, 1], [], []>} : vector<8x32xf32>, vector<32x128xf32>, vector<8x128xf32> -> vector<8x128xf32>
    %94 = arith.addf %91, %93 : vector<8x128xf32>
    %95 = arith.negf %94 : vector<8x128xf32>
    %96 = math.exp %95 : vector<8x128xf32>
    %cst_33 = arith.constant 1.000000e+00 : f32
    %97 = vector.broadcast %cst_33 : f32 to vector<8x128xf32>
    %98 = arith.addf %97, %96 : vector<8x128xf32>
    %99 = arith.divf %97, %98 : vector<8x128xf32>
    %100 = math.tanh %94 : vector<8x128xf32>
    %101 = vector.extract_strided_slice %99 {offsets = [0, 0], sizes = [8, 32], strides = [1, 1]} : vector<8x128xf32> to vector<8x32xf32>
    %102 = vector.extract_strided_slice %99 {offsets = [0, 32], sizes = [8, 32], strides = [1, 1]} : vector<8x128xf32> to vector<8x32xf32>
    %103 = vector.extract_strided_slice %100 {offsets = [0, 64], sizes = [8, 32], strides = [1, 1]} : vector<8x128xf32> to vector<8x32xf32>
    %104 = vector.extract_strided_slice %99 {offsets = [0, 96], sizes = [8, 32], strides = [1, 1]} : vector<8x128xf32> to vector<8x32xf32>
    %105 = arith.mulf %102, %86 : vector<8x32xf32>
    %106 = arith.mulf %101, %103 : vector<8x32xf32>
    %107 = arith.addf %105, %106 : vector<8x32xf32>
    %108 = math.tanh %107 : vector<8x32xf32>
    %109 = arith.mulf %104, %108 : vector<8x32xf32>
    %c5_i32 = arith.constant 5 : i32
    %110 = arith.index_cast %c5_i32 : i32 to index
    %c0_34 = arith.constant 0 : index
    %c0_35 = arith.constant 0 : index
    %111 = vector.load %arg2[%110, %c0_34, %c0_35] : memref<8x8x128xf32, #tpu.memory_space<vmem>>, vector<1x8x128xf32>
    %112 = vector.shape_cast %111 : vector<1x8x128xf32> to vector<8x128xf32>
    %c0_36 = arith.constant 0 : index
    %c0_37 = arith.constant 0 : index
    %113 = vector.load %arg3[%c0_36, %c0_37] : memref<32x128xf32, #tpu.memory_space<vmem>>, vector<32x128xf32>
    %cst_38 = arith.constant dense<0.000000e+00> : vector<8x128xf32>
    %114 = tpu.matmul %109, %113, %cst_38 {dimension_numbers = #tpu.dot_dimension_numbers<[1], [0], [0], [1], [0, 0, 1, 1], [], []>} : vector<8x32xf32>, vector<32x128xf32>, vector<8x128xf32> -> vector<8x128xf32>
    %115 = arith.addf %112, %114 : vector<8x128xf32>
    %116 = arith.negf %115 : vector<8x128xf32>
    %117 = math.exp %116 : vector<8x128xf32>
    %cst_39 = arith.constant 1.000000e+00 : f32
    %118 = vector.broadcast %cst_39 : f32 to vector<8x128xf32>
    %119 = arith.addf %118, %117 : vector<8x128xf32>
    %120 = arith.divf %118, %119 : vector<8x128xf32>
    %121 = math.tanh %115 : vector<8x128xf32>
    %122 = vector.extract_strided_slice %120 {offsets = [0, 0], sizes = [8, 32], strides = [1, 1]} : vector<8x128xf32> to vector<8x32xf32>
    %123 = vector.extract_strided_slice %120 {offsets = [0, 32], sizes = [8, 32], strides = [1, 1]} : vector<8x128xf32> to vector<8x32xf32>
    %124 = vector.extract_strided_slice %121 {offsets = [0, 64], sizes = [8, 32], strides = [1, 1]} : vector<8x128xf32> to vector<8x32xf32>
    %125 = vector.extract_strided_slice %120 {offsets = [0, 96], sizes = [8, 32], strides = [1, 1]} : vector<8x128xf32> to vector<8x32xf32>
    %126 = arith.mulf %123, %107 : vector<8x32xf32>
    %127 = arith.mulf %122, %124 : vector<8x32xf32>
    %128 = arith.addf %126, %127 : vector<8x32xf32>
    %129 = math.tanh %128 : vector<8x32xf32>
    %130 = arith.mulf %125, %129 : vector<8x32xf32>
    %c6_i32 = arith.constant 6 : i32
    %131 = arith.index_cast %c6_i32 : i32 to index
    %c0_40 = arith.constant 0 : index
    %c0_41 = arith.constant 0 : index
    %132 = vector.load %arg2[%131, %c0_40, %c0_41] : memref<8x8x128xf32, #tpu.memory_space<vmem>>, vector<1x8x128xf32>
    %133 = vector.shape_cast %132 : vector<1x8x128xf32> to vector<8x128xf32>
    %c0_42 = arith.constant 0 : index
    %c0_43 = arith.constant 0 : index
    %134 = vector.load %arg3[%c0_42, %c0_43] : memref<32x128xf32, #tpu.memory_space<vmem>>, vector<32x128xf32>
    %cst_44 = arith.constant dense<0.000000e+00> : vector<8x128xf32>
    %135 = tpu.matmul %130, %134, %cst_44 {dimension_numbers = #tpu.dot_dimension_numbers<[1], [0], [0], [1], [0, 0, 1, 1], [], []>} : vector<8x32xf32>, vector<32x128xf32>, vector<8x128xf32> -> vector<8x128xf32>
    %136 = arith.addf %133, %135 : vector<8x128xf32>
    %137 = arith.negf %136 : vector<8x128xf32>
    %138 = math.exp %137 : vector<8x128xf32>
    %cst_45 = arith.constant 1.000000e+00 : f32
    %139 = vector.broadcast %cst_45 : f32 to vector<8x128xf32>
    %140 = arith.addf %139, %138 : vector<8x128xf32>
    %141 = arith.divf %139, %140 : vector<8x128xf32>
    %142 = math.tanh %136 : vector<8x128xf32>
    %143 = vector.extract_strided_slice %141 {offsets = [0, 0], sizes = [8, 32], strides = [1, 1]} : vector<8x128xf32> to vector<8x32xf32>
    %144 = vector.extract_strided_slice %141 {offsets = [0, 32], sizes = [8, 32], strides = [1, 1]} : vector<8x128xf32> to vector<8x32xf32>
    %145 = vector.extract_strided_slice %142 {offsets = [0, 64], sizes = [8, 32], strides = [1, 1]} : vector<8x128xf32> to vector<8x32xf32>
    %146 = vector.extract_strided_slice %141 {offsets = [0, 96], sizes = [8, 32], strides = [1, 1]} : vector<8x128xf32> to vector<8x32xf32>
    %147 = arith.mulf %144, %128 : vector<8x32xf32>
    %148 = arith.mulf %143, %145 : vector<8x32xf32>
    %149 = arith.addf %147, %148 : vector<8x32xf32>
    %150 = math.tanh %149 : vector<8x32xf32>
    %151 = arith.mulf %146, %150 : vector<8x32xf32>
    %c7_i32 = arith.constant 7 : i32
    %152 = arith.index_cast %c7_i32 : i32 to index
    %c0_46 = arith.constant 0 : index
    %c0_47 = arith.constant 0 : index
    %153 = vector.load %arg2[%152, %c0_46, %c0_47] : memref<8x8x128xf32, #tpu.memory_space<vmem>>, vector<1x8x128xf32>
    %154 = vector.shape_cast %153 : vector<1x8x128xf32> to vector<8x128xf32>
    %c0_48 = arith.constant 0 : index
    %c0_49 = arith.constant 0 : index
    %155 = vector.load %arg3[%c0_48, %c0_49] : memref<32x128xf32, #tpu.memory_space<vmem>>, vector<32x128xf32>
    %cst_50 = arith.constant dense<0.000000e+00> : vector<8x128xf32>
    %156 = tpu.matmul %151, %155, %cst_50 {dimension_numbers = #tpu.dot_dimension_numbers<[1], [0], [0], [1], [0, 0, 1, 1], [], []>} : vector<8x32xf32>, vector<32x128xf32>, vector<8x128xf32> -> vector<8x128xf32>
    %157 = arith.addf %154, %156 : vector<8x128xf32>
    %158 = arith.negf %157 : vector<8x128xf32>
    %159 = math.exp %158 : vector<8x128xf32>
    %cst_51 = arith.constant 1.000000e+00 : f32
    %160 = vector.broadcast %cst_51 : f32 to vector<8x128xf32>
    %161 = arith.addf %160, %159 : vector<8x128xf32>
    %162 = arith.divf %160, %161 : vector<8x128xf32>
    %163 = math.tanh %157 : vector<8x128xf32>
    %164 = vector.extract_strided_slice %162 {offsets = [0, 0], sizes = [8, 32], strides = [1, 1]} : vector<8x128xf32> to vector<8x32xf32>
    %165 = vector.extract_strided_slice %162 {offsets = [0, 32], sizes = [8, 32], strides = [1, 1]} : vector<8x128xf32> to vector<8x32xf32>
    %166 = vector.extract_strided_slice %163 {offsets = [0, 64], sizes = [8, 32], strides = [1, 1]} : vector<8x128xf32> to vector<8x32xf32>
    %167 = vector.extract_strided_slice %162 {offsets = [0, 96], sizes = [8, 32], strides = [1, 1]} : vector<8x128xf32> to vector<8x32xf32>
    %168 = arith.mulf %165, %149 : vector<8x32xf32>
    %169 = arith.mulf %164, %166 : vector<8x32xf32>
    %170 = arith.addf %168, %169 : vector<8x32xf32>
    %171 = math.tanh %170 : vector<8x32xf32>
    %172 = arith.mulf %167, %171 : vector<8x32xf32>
    %c8_i32 = arith.constant 8 : i32
    %c0_52 = arith.constant 0 : index
    %c0_53 = arith.constant 0 : index
    %173 = vector.load %arg7[%c0_52, %c0_53] : memref<8x32xf32, #tpu.memory_space<vmem>>, vector<8x32xf32>
    tpu.vector_store %arg7[%c0_52, %c0_53], %172 {strides = array<i32>} : memref<8x32xf32, #tpu.memory_space<vmem>>, vector<8x32xf32>,
    %c0_54 = arith.constant 0 : index
    %c0_55 = arith.constant 0 : index
    %174 = vector.load %arg8[%c0_54, %c0_55] : memref<8x32xf32, #tpu.memory_space<vmem>>, vector<8x32xf32>
    tpu.vector_store %arg8[%c0_54, %c0_55], %170 {strides = array<i32>} : memref<8x32xf32, #tpu.memory_space<vmem>>, vector<8x32xf32>,
    %c0_i32_56 = arith.constant 0 : i32
    %175 = arith.cmpi eq, %arg1, %c0_i32_56 : i32
    %176 = arith.extui %175 : i1 to i32
    %c0_i32_57 = arith.constant 0 : i32
    %177 = arith.cmpi ne, %176, %c0_i32_57 : i32
    scf.if %177 {
      %c0_58 = arith.constant 0 : index
      %c0_59 = arith.constant 0 : index
      %178 = vector.load %arg4[%c0_58, %c0_59] : memref<32x16xf32, #tpu.memory_space<vmem>>, vector<32x16xf32>
      %cst_60 = arith.constant dense<0.000000e+00> : vector<8x16xf32>
      %179 = tpu.matmul %172, %178, %cst_60 {dimension_numbers = #tpu.dot_dimension_numbers<[1], [0], [0], [1], [0, 0, 1, 1], [], []>} : vector<8x32xf32>, vector<32x16xf32>, vector<8x16xf32> -> vector<8x16xf32>
      %c0_61 = arith.constant 0 : index
      %c0_62 = arith.constant 0 : index
      %180 = vector.load %arg5[%c0_61, %c0_62] : memref<1x16xf32, #tpu.memory_space<vmem>>, vector<1x16xf32>
      %181 = vector.broadcast %180 : vector<1x16xf32> to vector<8x16xf32>
      %182 = arith.addf %179, %181 : vector<8x16xf32>
      %c0_63 = arith.constant 0 : index
      %c0_64 = arith.constant 0 : index
      %183 = vector.load %arg6[%c0_63, %c0_64] : memref<8x16xf32, #tpu.memory_space<vmem>>, vector<8x16xf32>
      tpu.vector_store %arg6[%c0_63, %c0_64], %182 {strides = array<i32>} : memref<8x16xf32, #tpu.memory_space<vmem>>, vector<8x16xf32>,
    } else {
    }
    return
  }
  func.func @transform_0(%arg0: i32, %arg1: i32) -> (i32, i32, i32) {
    %c0_i32 = arith.constant 0 : i32
    %c0_i32_0 = arith.constant 0 : i32
    return %arg1, %arg0, %c0_i32 : i32, i32, i32
  }
  func.func @transform_1(%arg0: i32, %arg1: i32) -> (i32, i32) {
    %c0_i32 = arith.constant 0 : i32
    %c0_i32_0 = arith.constant 0 : i32
    %c0_i32_1 = arith.constant 0 : i32
    return %c0_i32, %c0_i32_0 : i32, i32
  }
  func.func @transform_2(%arg0: i32, %arg1: i32) -> (i32, i32) {
    %c0_i32 = arith.constant 0 : i32
    %c0_i32_0 = arith.constant 0 : i32
    %c0_i32_1 = arith.constant 0 : i32
    return %c0_i32, %c0_i32_0 : i32, i32
  }
  func.func @transform_3(%arg0: i32, %arg1: i32) -> (i32, i32) {
    %c0_i32 = arith.constant 0 : i32
    %c0_i32_0 = arith.constant 0 : i32
    %c0_i32_1 = arith.constant 0 : i32
    return %c0_i32, %c0_i32_0 : i32, i32
  }
  func.func @transform_4(%arg0: i32, %arg1: i32) -> (i32, i32) {
    %c0_i32 = arith.constant 0 : i32
    %c0_i32_0 = arith.constant 0 : i32
    return %arg0, %c0_i32 : i32, i32
  }
}

</mosaic_0001>

<bundles_post_ra>
// kernel: custom_lstm_forward.1
= control target key start
LH: loop header
LB: loop body
LE: loop exit
PB: predicated region body
PF: predicated region fallthrough
CT: control target
= control target key end

     0   :  { %vm21_vm0 = vcmask 261120   ;;  %v694_v2 = vmov 0.0   ;;  %s695_s24 = smov 64   ;;  %s696_s25 = smov 32   ;;  %s823_s1 = inlined_call_operand.vmem [shape: f32[32,128], index: 1, kind: input, shape index: {}]   ;;  %s824_s0 = inlined_call_operand.vmem [shape: f32[8,8,128], index: 0, kind: input, shape index: {}]   ;;  %s825_s3 = inlined_call_operand.vmem [shape: f32[1,16], index: 3, kind: input, shape index: {}]   ;;  %s826_s2 = inlined_call_operand.vmem [shape: f32[32,16], index: 2, kind: input, shape index: {}]   ;;  %s827_s4 = inlined_call_operand.vmem [shape: f32[8,16], index: 4, kind: output, shape index: {}]  }
   0x1   :  { %v30_v0 = vld [vmem:[%s823_s1 + $0x18] sm:$0xff]  ;;  %v29_v1 = vld [vmem:[%s823_s1 + $0x10] sm:$0xff]  ;;  %22 = vst.msk [vmem:[#allocation2] sm:$0xff] %vm21_vm0, %v694_v2  ;;  %v28_v3 = vld [vmem:[%s823_s1 + $0x8] sm:$0xff] }
   0x2   :  { %47 = vmatpush.msra.mxu0 %v30_v0  ;;  %23 = vst.msk [vmem:[#allocation3] sm:$0xff] %vm21_vm0, %v694_v2  ;;  %116 = vmatpush.msra.mxu1 %v30_v0  ;;  %v27_v4 = vld [vmem:[%s823_s1] sm:$0xff]  ;;  %v603_v34 = vld [vmem:[%s824_s0 + $0x8] sm:$0xff]  ;;  %v606_v60 = vld [vmem:[%s824_s0 + $0x10] sm:$0xff] }
   0x3   :  { %181 = vmatpush.msra.mxu2 %v30_v0  ;;  %246 = vmatpush.msra.mxu3 %v30_v0  ;;  %v26_v6 = vld [vmem:[%s824_s0] sm:$0xff] }
   0x4   :  { %48 = vmatpush.msra.mxu0 %v29_v1  ;;  %117 = vmatpush.msra.mxu1 %v29_v1 }
   0x5   :  { %182 = vmatpush.msra.mxu2 %v29_v1  ;;  %247 = vmatpush.msra.mxu3 %v29_v1 }
   0x6   :  { %49 = vmatpush.msra.mxu0 %v28_v3  ;;  %118 = vmatpush.msra.mxu1 %v28_v3 }
   0x7   :  { %183 = vmatpush.msra.mxu2 %v28_v3  ;;  %248 = vmatpush.msra.mxu3 %v28_v3 }
   0x8   :  { %50 = vmatpush.msra.mxu0 %v27_v4  ;;  %v24_v5 = vld [vmem:[#allocation2] sm:$0xff]  ;;  %119 = vmatpush.msra.mxu1 %v27_v4 }
   0x9   :  { %601 = vmatmul.msk.f32.vlgmr.msra.gmra.mxu0 %vm21_vm0, %v24_v5  ;;  %184 = vmatpush.msra.mxu2 %v27_v4  ;;  %v25_v10 = vld [vmem:[#allocation3] sm:$0xff] }
   0xa   :  { %249 = vmatpush.msra.mxu3 %v27_v4  ;;  %311 = vmatpush.msrb.mxu0 %v30_v0 }
   0xb   :  { %376 = vmatpush.msrb.mxu1 %v30_v0  ;;  %441 = vmatpush.msrb.mxu2 %v30_v0 }
   0xc   :  { %312 = vmatpush.msrb.mxu0 %v29_v1  ;;  %506 = vmatpush.msrb.mxu3 %v30_v0 }
   0xd   :  { %377 = vmatpush.msrb.mxu1 %v29_v1  ;;  %442 = vmatpush.msrb.mxu2 %v29_v1 }
   0xe   :  { %313 = vmatpush.msrb.mxu0 %v28_v3  ;;  %507 = vmatpush.msrb.mxu3 %v29_v1 }
   0xf   :  { %378 = vmatpush.msrb.mxu1 %v28_v3  ;;  %443 = vmatpush.msrb.mxu2 %v28_v3 }
  0x10   :  { %314 = vmatpush.msrb.mxu0 %v27_v4  ;;  %508 = vmatpush.msrb.mxu3 %v28_v3 }
  0x11   :  { %379 = vmatpush.msrb.mxu1 %v27_v4  ;;  %444 = vmatpush.msrb.mxu2 %v27_v4 }
  0x12   :  { %509 = vmatpush.msrb.mxu3 %v27_v4 }
  0x86   :  { %v52_v7 = vpop.f32.mrf.mxu0 }
  0x87   :  { %v55_v8 = vadd.f32 %v52_v7, %v26_v6 }
  0x89   :  { %630 = vtanh.f32 %v55_v8  ;;  %v602_v11 = vmul.f32 -1.442695, %v55_v8 }
  0x8b   :  { %632 = vpow2.f32 %v602_v11 }
  0x8f   :  { %v631_v9 = vpop.eup %630 }
  0x90   :  { %82 = vrot.lane.b32.xlu0 %v631_v9, %s695_s24 }
  0x91   :  { %v633_v12 = vpop.eup %632 }
  0x92   :  { %v59_v13 = vadd.f32 1.0, %v633_v12 }
  0x94   :  { %634 = vrcp.f32 %v59_v13  ;;  %v71_v19 = vand.u32 2147483648, %v59_v13  ;;  %vm65_vm2 = vweird.f32 %v59_v13  ;;  %v69_v20 = vand.u32 2147483647, %v59_v13 }
  0x96   :  { %v72_v22 = vor.u32 1.1754944e-38, %v71_v19  ;;  %vm70_vm4 = vcmp.eq.f32.partialorder %v69_v20, 8.507059e+37 }
  0x98   :  { %77 = vrot.lane.b32.xlu0 %v25_v10, %s696_s25 }
  0x9a   :  { %v635_v14 = vpop.eup %634 }
  0x9b   :  { %v61_v15 = vmul.f32 %v635_v14, %v59_v13  ;;  %vm66_vm1 = vweird.f32 %v635_v14 }
  0x9c   :  { %vm67_vm3 = vmor %vm65_vm2, %vm66_vm1 }
  0x9d   :  { %v62_v16 = vsub.f32 1.0, %v61_v15 }
  0x9f   :  { %v63_v17 = vmul.f32 %v635_v14, %v62_v16 }
  0xa1   :  { %v64_v18 = vadd.f32 %v635_v14, %v63_v17 }
  0xa3   :  { %v68_v21 = vsel %vm67_vm3, %v635_v14, %v64_v18 }
  0xa4   :  { %v73_v24 = vsel %vm70_vm4, %v72_v22, %v68_v21  ;;  %v609_v22 = vld [vmem:[%s824_s0 + $0x18] sm:$0xff] }
 0x102   :  { %v83_v23 = vpop.permute.xlu0 %82 }
 0x103   :  { %v85_v25 = vmul.f32 %v83_v23, %v73_v24 }
 0x105   :  { %87 = vrot.lane.b32.xlu1 %v85_v25, %s696_s25 }
 0x10a   :  { %v78_v26 = vpop.permute.xlu0 %77 }
 0x10b   :  { %v80_v27 = vmul.f32 %v78_v26, %v73_v24 }
 0x177   :  { %v88_v28 = vpop.permute.xlu1 %87 }
 0x178   :  { %v90_v29 = vadd.f32 %v88_v28, %v80_v27 }
 0x17a   :  { %636 = vtanh.f32 %v90_v29 }
 0x180   :  { %v637_v30 = vpop.eup %636 }
 0x181   :  { %93 = vrot.lane.b32.xlu1 %v637_v30, %s695_s24 }
 0x1f3   :  { %v94_v31 = vpop.permute.xlu1 %93 }
 0x1f4   :  { %v96_v32 = vmul.f32 %v94_v31, %v73_v24 }
 0x1f6   :  { %100 = vrot.lane.b32.xlu2 %v96_v32, %s696_s25 }
 0x250   :  { %v101_v33 = vpop.permute.xlu2 %100 }
 0x251   :  { %604 = vmatmul.msk.f32.vlgmr.msra.gmra.mxu1 %vm21_vm0, %v101_v33 }
 0x2ce   :  { %v121_v35 = vpop.f32.mrf.mxu1 }
 0x2cf   :  { %v124_v36 = vadd.f32 %v603_v34, %v121_v35 }
 0x2d1   :  { %638 = vtanh.f32 %v124_v36  ;;  %v605_v38 = vmul.f32 -1.442695, %v124_v36 }
 0x2d3   :  { %640 = vpow2.f32 %v605_v38 }
 0x2d7   :  { %v639_v37 = vpop.eup %638 }
 0x2d8   :  { %147 = vrot.lane.b32.xlu2 %v639_v37, %s695_s24 }
 0x2d9   :  { %v641_v39 = vpop.eup %640 }
 0x2da   :  { %v128_v40 = vadd.f32 1.0, %v641_v39 }
 0x2dc   :  { %642 = vrcp.f32 %v128_v40  ;;  %v140_v46 = vand.u32 2147483648, %v128_v40  ;;  %vm134_vm6 = vweird.f32 %v128_v40  ;;  %v138_v47 = vand.u32 2147483647, %v128_v40 }
 0x2de   :  { %v141_v49 = vor.u32 1.1754944e-38, %v140_v46  ;;  %vm139_vm8 = vcmp.eq.f32.partialorder %v138_v47, 8.507059e+37 }
 0x2e2   :  { %v643_v41 = vpop.eup %642 }
 0x2e3   :  { %v130_v42 = vmul.f32 %v643_v41, %v128_v40  ;;  %vm135_vm5 = vweird.f32 %v643_v41 }
 0x2e4   :  { %vm136_vm7 = vmor %vm134_vm6, %vm135_vm5 }
 0x2e5   :  { %v131_v43 = vsub.f32 1.0, %v130_v42 }
 0x2e7   :  { %v132_v44 = vmul.f32 %v643_v41, %v131_v43 }
 0x2e9   :  { %v133_v45 = vadd.f32 %v643_v41, %v132_v44 }
 0x2eb   :  { %v137_v48 = vsel %vm136_vm7, %v643_v41, %v133_v45 }
 0x2ec   :  { %v142_v51 = vsel %vm139_vm8, %v141_v49, %v137_v48  ;;  %v612_v48 = vld [vmem:[%s824_s0 + $0x20] sm:$0xff] }
 0x2ed   :  { %v145_v53 = vmul.f32 %v142_v51, %v90_v29 }
 0x332   :  { %v148_v50 = vpop.permute.xlu2 %147 }
 0x333   :  { %v150_v52 = vmul.f32 %v148_v50, %v142_v51 }
 0x335   :  { %152 = vrot.lane.b32.xlu0 %v150_v52, %s696_s25 }
 0x3a7   :  { %v153_v54 = vpop.permute.xlu0 %152 }
 0x3a8   :  { %v155_v55 = vadd.f32 %v153_v54, %v145_v53 }
 0x3aa   :  { %644 = vtanh.f32 %v155_v55 }
 0x3b0   :  { %v645_v56 = vpop.eup %644 }
 0x3b1   :  { %158 = vrot.lane.b32.xlu1 %v645_v56, %s695_s24 }
 0x423   :  { %v159_v57 = vpop.permute.xlu1 %158 }
 0x424   :  { %v161_v58 = vmul.f32 %v159_v57, %v142_v51 }
 0x426   :  { %165 = vrot.lane.b32.xlu2 %v161_v58, %s696_s25 }
 0x480   :  { %v166_v59 = vpop.permute.xlu2 %165 }
 0x481   :  { %607 = vmatmul.msk.f32.vlgmr.msra.gmra.mxu2 %vm21_vm0, %v166_v59 }
 0x504   :  { %v186_v61 = vpop.f32.mrf.mxu2 }
 0x505   :  { %v189_v62 = vadd.f32 %v606_v60, %v186_v61 }
 0x507   :  { %646 = vtanh.f32 %v189_v62  ;;  %v608_v0 = vmul.f32 -1.442695, %v189_v62 }
 0x509   :  { %648 = vpow2.f32 %v608_v0 }
 0x50d   :  { %v647_v63 = vpop.eup %646 }
 0x50e   :  { %212 = vrot.lane.b32.xlu0 %v647_v63, %s695_s24 }
 0x50f   :  { %v649_v1 = vpop.eup %648 }
 0x510   :  { %v193_v2 = vadd.f32 1.0, %v649_v1 }
 0x512   :  { %650 = vrcp.f32 %v193_v2  ;;  %v205_v8 = vand.u32 2147483648, %v193_v2  ;;  %vm199_vm10 = vweird.f32 %v193_v2  ;;  %v203_v9 = vand.u32 2147483647, %v193_v2 }
 0x514   :  { %v206_v11 = vor.u32 1.1754944e-38, %v205_v8  ;;  %vm204_vm12 = vcmp.eq.f32.partialorder %v203_v9, 8.507059e+37 }
 0x518   :  { %v651_v3 = vpop.eup %650 }
 0x519   :  { %v195_v4 = vmul.f32 %v651_v3, %v193_v2  ;;  %vm200_vm9 = vweird.f32 %v651_v3 }
 0x51a   :  { %vm201_vm11 = vmor %vm199_vm10, %vm200_vm9 }
 0x51b   :  { %v196_v5 = vsub.f32 1.0, %v195_v4 }
 0x51d   :  { %v197_v6 = vmul.f32 %v651_v3, %v196_v5 }
 0x51f   :  { %v198_v7 = vadd.f32 %v651_v3, %v197_v6 }
 0x521   :  { %v202_v10 = vsel %vm201_vm11, %v651_v3, %v198_v7 }
 0x522   :  { %v207_v13 = vsel %vm204_vm12, %v206_v11, %v202_v10  ;;  %v615_v10 = vld [vmem:[%s824_s0 + $0x28] sm:$0xff] }
 0x523   :  { %v210_v15 = vmul.f32 %v207_v13, %v155_v55 }
 0x580   :  { %v213_v12 = vpop.permute.xlu0 %212 }
 0x581   :  { %v215_v14 = vmul.f32 %v213_v12, %v207_v13 }
 0x583   :  { %217 = vrot.lane.b32.xlu1 %v215_v14, %s696_s25 }
 0x5f5   :  { %v218_v16 = vpop.permute.xlu1 %217 }
 0x5f6   :  { %v220_v17 = vadd.f32 %v218_v16, %v210_v15 }
 0x5f8   :  { %652 = vtanh.f32 %v220_v17 }
 0x5fe   :  { %v653_v18 = vpop.eup %652 }
 0x5ff   :  { %223 = vrot.lane.b32.xlu2 %v653_v18, %s695_s24 }
 0x659   :  { %v224_v19 = vpop.permute.xlu2 %223 }
 0x65a   :  { %v226_v20 = vmul.f32 %v224_v19, %v207_v13 }
 0x65c   :  { %230 = vrot.lane.b32.xlu0 %v226_v20, %s696_s25 }
 0x6ce   :  { %v231_v21 = vpop.permute.xlu0 %230 }
 0x6cf   :  { %610 = vmatmul.msk.f32.vlgmr.msra.gmra.mxu3 %vm21_vm0, %v231_v21 }
 0x752   :  { %v251_v23 = vpop.f32.mrf.mxu3 }
 0x753   :  { %v254_v24 = vadd.f32 %v609_v22, %v251_v23 }
 0x755   :  { %654 = vtanh.f32 %v254_v24  ;;  %v611_v26 = vmul.f32 -1.442695, %v254_v24 }
 0x757   :  { %656 = vpow2.f32 %v611_v26 }
 0x75b   :  { %v655_v25 = vpop.eup %654 }
 0x75c   :  { %277 = vrot.lane.b32.xlu1 %v655_v25, %s695_s24 }
 0x75d   :  { %v657_v27 = vpop.eup %656 }
 0x75e   :  { %v258_v28 = vadd.f32 1.0, %v657_v27 }
 0x760   :  { %658 = vrcp.f32 %v258_v28  ;;  %v270_v34 = vand.u32 2147483648, %v258_v28  ;;  %vm264_vm14 = vweird.f32 %v258_v28  ;;  %v268_v35 = vand.u32 2147483647, %v258_v28 }
 0x762   :  { %v271_v37 = vor.u32 1.1754944e-38, %v270_v34  ;;  %vm269_vm1 = vcmp.eq.f32.partialorder %v268_v35, 8.507059e+37 }
 0x766   :  { %v659_v29 = vpop.eup %658 }
 0x767   :  { %v260_v30 = vmul.f32 %v659_v29, %v258_v28  ;;  %vm265_vm13 = vweird.f32 %v659_v29 }
 0x768   :  { %vm266_vm15 = vmor %vm264_vm14, %vm265_vm13 }
 0x769   :  { %v261_v31 = vsub.f32 1.0, %v260_v30 }
 0x76b   :  { %v262_v32 = vmul.f32 %v659_v29, %v261_v31 }
 0x76d   :  { %v263_v33 = vadd.f32 %v659_v29, %v262_v32 }
 0x76f   :  { %v267_v36 = vsel %vm266_vm15, %v659_v29, %v263_v33 }
 0x770   :  { %v272_v39 = vsel %vm269_vm1, %v271_v37, %v267_v36  ;;  %v618_v36 = vld [vmem:[%s824_s0 + $0x30] sm:$0xff] }
 0x771   :  { %v275_v41 = vmul.f32 %v272_v39, %v220_v17 }
 0x7ce   :  { %v278_v38 = vpop.permute.xlu1 %277 }
 0x7cf   :  { %v280_v40 = vmul.f32 %v278_v38, %v272_v39 }
 0x7d1   :  { %282 = vrot.lane.b32.xlu2 %v280_v40, %s696_s25 }
 0x82b   :  { %v283_v42 = vpop.permute.xlu2 %282 }
 0x82c   :  { %v285_v43 = vadd.f32 %v283_v42, %v275_v41 }
 0x82e   :  { %660 = vtanh.f32 %v285_v43 }
 0x834   :  { %v661_v44 = vpop.eup %660 }
 0x835   :  { %288 = vrot.lane.b32.xlu0 %v661_v44, %s695_s24 }
 0x8a7   :  { %v289_v45 = vpop.permute.xlu0 %288 }
 0x8a8   :  { %v291_v46 = vmul.f32 %v289_v45, %v272_v39 }
 0x8aa   :  { %295 = vrot.lane.b32.xlu1 %v291_v46, %s696_s25 }
 0x91c   :  { %v296_v47 = vpop.permute.xlu1 %295 }
 0x91d   :  { %613 = vmatmul.msk.f32.vlgmr.msrb.gmra.mxu0 %vm21_vm0, %v296_v47 }
 0x99a   :  { %v316_v49 = vpop.f32.mrf.mxu0 }
 0x99b   :  { %v319_v50 = vadd.f32 %v612_v48, %v316_v49 }
 0x99d   :  { %662 = vtanh.f32 %v319_v50  ;;  %v614_v52 = vmul.f32 -1.442695, %v319_v50 }
 0x99f   :  { %664 = vpow2.f32 %v614_v52 }
 0x9a3   :  { %v663_v51 = vpop.eup %662 }
 0x9a4   :  { %342 = vrot.lane.b32.xlu2 %v663_v51, %s695_s24 }
 0x9a5   :  { %v665_v53 = vpop.eup %664 }
 0x9a6   :  { %v323_v54 = vadd.f32 1.0, %v665_v53 }
 0x9a8   :  { %666 = vrcp.f32 %v323_v54  ;;  %v335_v60 = vand.u32 2147483648, %v323_v54  ;;  %vm329_vm3 = vweird.f32 %v323_v54  ;;  %v333_v61 = vand.u32 2147483647, %v323_v54 }
 0x9aa   :  { %v336_v63 = vor.u32 1.1754944e-38, %v335_v60  ;;  %vm334_vm5 = vcmp.eq.f32.partialorder %v333_v61, 8.507059e+37 }
 0x9ae   :  { %v667_v55 = vpop.eup %666 }
 0x9af   :  { %v325_v56 = vmul.f32 %v667_v55, %v323_v54  ;;  %vm330_vm2 = vweird.f32 %v667_v55 }
 0x9b0   :  { %vm331_vm4 = vmor %vm329_vm3, %vm330_vm2  ;;  %vm595_vm3 = vcmask 130048  }
 0x9b1   :  { %v326_v57 = vsub.f32 1.0, %v325_v56 }
 0x9b3   :  { %v327_v58 = vmul.f32 %v667_v55, %v326_v57 }
 0x9b5   :  { %v328_v59 = vadd.f32 %v667_v55, %v327_v58 }
 0x9b7   :  { %v332_v62 = vsel %vm331_vm4, %v667_v55, %v328_v59 }
 0x9b8   :  { %v337_v1 = vsel %vm334_vm5, %v336_v63, %v332_v62  ;;  %v621_v62 = vld [vmem:[%s824_s0 + $0x38] sm:$0xff]  ;;  %s697_s0 = smov 96  }
 0x9b9   :  { %v340_v3 = vmul.f32 %v337_v1, %v285_v43 }
 0x9fe   :  { %v343_v0 = vpop.permute.xlu2 %342 }
 0x9ff   :  { %v345_v2 = vmul.f32 %v343_v0, %v337_v1 }
 0xa01   :  { %347 = vrot.lane.b32.xlu0 %v345_v2, %s696_s25 }
 0xa73   :  { %v348_v4 = vpop.permute.xlu0 %347 }
 0xa74   :  { %v350_v5 = vadd.f32 %v348_v4, %v340_v3 }
 0xa76   :  { %668 = vtanh.f32 %v350_v5 }
 0xa7c   :  { %v669_v6 = vpop.eup %668 }
 0xa7d   :  { %353 = vrot.lane.b32.xlu1 %v669_v6, %s695_s24 }
 0xaef   :  { %v354_v7 = vpop.permute.xlu1 %353 }
 0xaf0   :  { %v356_v8 = vmul.f32 %v354_v7, %v337_v1 }
 0xaf2   :  { %360 = vrot.lane.b32.xlu2 %v356_v8, %s696_s25 }
 0xb4c   :  { %v361_v9 = vpop.permute.xlu2 %360 }
 0xb4d   :  { %616 = vmatmul.msk.f32.vlgmr.msrb.gmra.mxu1 %vm21_vm0, %v361_v9 }
 0xbca   :  { %v381_v11 = vpop.f32.mrf.mxu1 }
 0xbcb   :  { %v384_v12 = vadd.f32 %v615_v10, %v381_v11 }
 0xbcd   :  { %670 = vtanh.f32 %v384_v12  ;;  %v617_v14 = vmul.f32 -1.442695, %v384_v12 }
 0xbcf   :  { %672 = vpow2.f32 %v617_v14 }
 0xbd3   :  { %v671_v13 = vpop.eup %670 }
 0xbd4   :  { %407 = vrot.lane.b32.xlu0 %v671_v13, %s695_s24 }
 0xbd5   :  { %v673_v15 = vpop.eup %672 }
 0xbd6   :  { %v388_v16 = vadd.f32 1.0, %v673_v15 }
 0xbd8   :  { %674 = vrcp.f32 %v388_v16  ;;  %v400_v22 = vand.u32 2147483648, %v388_v16  ;;  %vm394_vm7 = vweird.f32 %v388_v16  ;;  %v398_v23 = vand.u32 2147483647, %v388_v16 }
 0xbda   :  { %v401_v25 = vor.u32 1.1754944e-38, %v400_v22  ;;  %vm399_vm9 = vcmp.eq.f32.partialorder %v398_v23, 8.507059e+37  ;;  %v567_v22 = vld [vmem:[%s826_s2 + $0x10] sm:$0xff]  ;;  %v566_v23 = vld [vmem:[%s826_s2 + $0x8] sm:$0xff] }
 0xbde   :  { %v675_v17 = vpop.eup %674 }
 0xbdf   :  { %v390_v18 = vmul.f32 %v675_v17, %v388_v16  ;;  %vm395_vm6 = vweird.f32 %v675_v17 }
 0xbe0   :  { %vm396_vm8 = vmor %vm394_vm7, %vm395_vm6 }
 0xbe1   :  { %v391_v19 = vsub.f32 1.0, %v390_v18 }
 0xbe3   :  { %v392_v20 = vmul.f32 %v675_v17, %v391_v19 }
 0xbe5   :  { %v393_v21 = vadd.f32 %v675_v17, %v392_v20 }
 0xbe7   :  { %v397_v24 = vsel %vm396_vm8, %v675_v17, %v393_v21  ;;  %v568_v21 = vld [vmem:[%s826_s2 + $0x18] sm:$0xff] }
 0xbe8   :  { %v402_v27 = vsel %vm399_vm9, %v401_v25, %v397_v24  ;;  %587 = vmatpush.msra.mxu0 %v568_v21  ;;  %v565_v24 = vld [vmem:[%s826_s2] sm:$0xff] }
 0xbe9   :  { %v405_v29 = vmul.f32 %v402_v27, %v350_v5 }
 0xbea   :  { %588 = vmatpush.msra.mxu0 %v567_v22 }
 0xbec   :  { %589 = vmatpush.msra.mxu0 %v566_v23 }
 0xbee   :  { %590 = vmatpush.msra.mxu0 %v565_v24 }
 0xc46   :  { %v408_v26 = vpop.permute.xlu0 %407 }
 0xc47   :  { %v410_v28 = vmul.f32 %v408_v26, %v402_v27 }
 0xc49   :  { %412 = vrot.lane.b32.xlu1 %v410_v28, %s696_s25 }
 0xcbb   :  { %v413_v30 = vpop.permute.xlu1 %412 }
 0xcbc   :  { %v415_v31 = vadd.f32 %v413_v30, %v405_v29  ;;  %v629_v29 = vld [vmem:[%s825_s3] ss:$0 sm:$0xff] }
 0xcbe   :  { %676 = vtanh.f32 %v415_v31 }
 0xcc4   :  { %v677_v32 = vpop.eup %676 }
 0xcc5   :  { %418 = vrot.lane.b32.xlu2 %v677_v32, %s695_s24 }
 0xd1f   :  { %v419_v33 = vpop.permute.xlu2 %418 }
 0xd20   :  { %v421_v34 = vmul.f32 %v419_v33, %v402_v27 }
 0xd22   :  { %425 = vrot.lane.b32.xlu0 %v421_v34, %s696_s25 }
 0xd94   :  { %v426_v35 = vpop.permute.xlu0 %425 }
 0xd95   :  { %619 = vmatmul.msk.f32.vlgmr.msrb.gmra.mxu2 %vm21_vm0, %v426_v35 }
 0xe18   :  { %v446_v37 = vpop.f32.mrf.mxu2 }
 0xe19   :  { %v449_v38 = vadd.f32 %v618_v36, %v446_v37 }
 0xe1b   :  { %678 = vtanh.f32 %v449_v38  ;;  %v620_v40 = vmul.f32 -1.442695, %v449_v38 }
 0xe1d   :  { %680 = vpow2.f32 %v620_v40 }
 0xe21   :  { %v679_v39 = vpop.eup %678 }
 0xe22   :  { %472 = vrot.lane.b32.xlu1 %v679_v39, %s695_s24 }
 0xe23   :  { %v681_v41 = vpop.eup %680 }
 0xe24   :  { %v453_v42 = vadd.f32 1.0, %v681_v41 }
 0xe26   :  { %682 = vrcp.f32 %v453_v42  ;;  %v465_v48 = vand.u32 2147483648, %v453_v42  ;;  %vm459_vm11 = vweird.f32 %v453_v42  ;;  %v463_v49 = vand.u32 2147483647, %v453_v42 }
 0xe28   :  { %v466_v51 = vor.u32 1.1754944e-38, %v465_v48  ;;  %vm464_vm13 = vcmp.eq.f32.partialorder %v463_v49, 8.507059e+37 }
 0xe2c   :  { %v683_v43 = vpop.eup %682 }
 0xe2d   :  { %v455_v44 = vmul.f32 %v683_v43, %v453_v42  ;;  %vm460_vm10 = vweird.f32 %v683_v43 }
 0xe2e   :  { %vm461_vm12 = vmor %vm459_vm11, %vm460_vm10 }
 0xe2f   :  { %v456_v45 = vsub.f32 1.0, %v455_v44 }
 0xe31   :  { %v457_v46 = vmul.f32 %v683_v43, %v456_v45 }
 0xe33   :  { %v458_v47 = vadd.f32 %v683_v43, %v457_v46 }
 0xe35   :  { %v462_v50 = vsel %vm461_vm12, %v683_v43, %v458_v47 }
 0xe36   :  { %v467_v53 = vsel %vm464_vm13, %v466_v51, %v462_v50 }
 0xe37   :  { %v470_v55 = vmul.f32 %v467_v53, %v415_v31 }
 0xe94   :  { %v473_v52 = vpop.permute.xlu1 %472 }
 0xe95   :  { %v475_v54 = vmul.f32 %v473_v52, %v467_v53 }
 0xe97   :  { %477 = vrot.lane.b32.xlu2 %v475_v54, %s696_s25 }
 0xef1   :  { %v478_v56 = vpop.permute.xlu2 %477 }
 0xef2   :  { %v480_v57 = vadd.f32 %v478_v56, %v470_v55 }
 0xef4   :  { %684 = vtanh.f32 %v480_v57 }
 0xefa   :  { %v685_v58 = vpop.eup %684 }
 0xefb   :  { %483 = vrot.lane.b32.xlu0 %v685_v58, %s695_s24 }
 0xf6d   :  { %v484_v59 = vpop.permute.xlu0 %483 }
 0xf6e   :  { %v486_v60 = vmul.f32 %v484_v59, %v467_v53 }
 0xf70   :  { %490 = vrot.lane.b32.xlu1 %v486_v60, %s696_s25 }
 0xfe2   :  { %v491_v61 = vpop.permute.xlu1 %490 }
 0xfe3   :  { %622 = vmatmul.msk.f32.vlgmr.msrb.gmra.mxu3 %vm21_vm0, %v491_v61 }
0x1066   :  { %v511_v63 = vpop.f32.mrf.mxu3 }
0x1067   :  { %v514_v0 = vadd.f32 %v621_v62, %v511_v63 }
0x1069   :  { %686 = vtanh.f32 %v514_v0  ;;  %v623_v2 = vmul.f32 -1.442695, %v514_v0 }
0x106b   :  { %688 = vpow2.f32 %v623_v2 }
0x106f   :  { %v687_v1 = vpop.eup %686 }
0x1070   :  { %537 = vrot.lane.b32.xlu2 %v687_v1, %s695_s24 }
0x1071   :  { %v689_v3 = vpop.eup %688 }
0x1072   :  { %v518_v4 = vadd.f32 1.0, %v689_v3 }
0x1074   :  { %690 = vrcp.f32 %v518_v4  ;;  %v530_v10 = vand.u32 2147483648, %v518_v4  ;;  %vm524_vm15 = vweird.f32 %v518_v4  ;;  %v528_v11 = vand.u32 2147483647, %v518_v4 }
0x1076   :  { %v531_v13 = vor.u32 1.1754944e-38, %v530_v10  ;;  %vm529_vm2 = vcmp.eq.f32.partialorder %v528_v11, 8.507059e+37 }
0x107a   :  { %v691_v5 = vpop.eup %690 }
0x107b   :  { %v520_v6 = vmul.f32 %v691_v5, %v518_v4  ;;  %vm525_vm14 = vweird.f32 %v691_v5 }
0x107c   :  { %vm526_vm1 = vmor %vm524_vm15, %vm525_vm14 }
0x107d   :  { %v521_v7 = vsub.f32 1.0, %v520_v6 }
0x107f   :  { %v522_v8 = vmul.f32 %v691_v5, %v521_v7 }
0x1081   :  { %v523_v9 = vadd.f32 %v691_v5, %v522_v8 }
0x1083   :  { %v527_v12 = vsel %vm526_vm1, %v691_v5, %v523_v9 }
0x1084   :  { %v532_v15 = vsel %vm529_vm2, %v531_v13, %v527_v12 }
0x1085   :  { %v535_v17 = vmul.f32 %v532_v15, %v480_v57 }
0x10ca   :  { %v538_v14 = vpop.permute.xlu2 %537 }
0x10cb   :  { %v540_v16 = vmul.f32 %v538_v14, %v532_v15 }
0x10cd   :  { %542 = vrot.lane.b32.xlu0 %v540_v16, %s696_s25 }
0x113f   :  { %v543_v18 = vpop.permute.xlu0 %542 }
0x1140   :  { %v545_v19 = vadd.f32 %v543_v18, %v535_v17 }
0x1142   :  { %692 = vtanh.f32 %v545_v19  ;;  %558 = vrot.lane.b32.xlu0 %v545_v19, %s697_s0 }
0x1148   :  { %v693_v20 = vpop.eup %692 }
0x1149   :  { %548 = vrot.lane.b32.xlu1 %v693_v20, %s695_s24 }
0x11b4   :  { %v559_v25 = vpop.permute.xlu0 %558 }
0x11b5   :  { %561 = vst.msk [vmem:[#allocation3] sm:$0xff] %vm21_vm0, %v559_v25 }
0x11bb   :  { %v549_v26 = vpop.permute.xlu1 %548 }
0x11bc   :  { %v551_v27 = vmul.f32 %v549_v26, %v532_v15 }
0x11be   :  { %553 = vrot.lane.b32.xlu2 %v551_v27, %s696_s25 }
0x1218   :  { %v554_v28 = vpop.permute.xlu2 %553 }
0x1219   :  { %556 = vst.msk [vmem:[#allocation2] sm:$0xff] %vm21_vm0, %v554_v28  ;;  %624 = vmatmul.msk.f32.vlgmr.msra.gmra.mxu0 %vm21_vm0, %v554_v28 }
0x1296   :  { %v592_v30 = vpop.f32.mrf.mxu0 }
0x1297   :  { %v593_v31 = vadd.f32 %v629_v29, %v592_v30 }
0x1299   :  { %596 = vst.msk [vmem:[%s827_s4] sm:$0xff] %vm595_vm3, %v593_v31 }

</bundles_post_ra>
